<compile_context>
chip_gen: v7x
topology: tpu7x:2x2x1
jax: 0.10.0
libtpu: 0.0.40
codegen_flags: <defaults>
</compile_context>

<pallas_src>
import jax
import jax.numpy as jnp
from jax import lax
from jax.experimental import pallas as pl
from jax.experimental.pallas import tpu as pltpu


def _round_up(x: int, m: int) -> int:
    return ((x + m - 1) // m) * m


def _pick_tile(dim: int, unit: int, max_tile: int):
    """Pick (tile, padded_dim): tile is a multiple of `unit`, <= max_tile,
    chosen to minimize the padded extent (ties -> largest tile)."""
    d = _round_up(dim, unit)
    if d <= max_tile:
        return d, d
    best_t, best_padded = unit, _round_up(d, unit)
    for t in range(unit, max_tile + 1, unit):
        padded = _round_up(d, t)
        if padded <= best_padded:           # ascending t => prefer larger tile on ties
            best_t, best_padded = t, padded
    return best_t, best_padded


def _linear_bias_kernel(x_ref, w_ref, b_ref, o_ref):
    # x_ref: (TM, TK), w_ref: (TK, TN), b_ref: (1, TN) f32, o_ref: (TM, TN) f32.
    # Output block is resident across the K grid axis -> accumulate in place.
    @pl.when(pl.program_id(2) == 0)
    def _():
        o_ref[...] = jnp.broadcast_to(b_ref[...], o_ref.shape)

    o_ref[...] += jnp.dot(x_ref[...], w_ref[...],
                          preferred_element_type=jnp.float32)


def _linear_nobias_kernel(x_ref, w_ref, o_ref):
    @pl.when(pl.program_id(2) == 0)
    def _():
        o_ref[...] = jnp.zeros_like(o_ref)

    o_ref[...] += jnp.dot(x_ref[...], w_ref[...],
                          preferred_element_type=jnp.float32)


def linear_probe(x, weight, bias=None, *, force_pallas=False, use_bf16=False):
    """y = x @ weight.T + bias (torch.nn.Linear semantics).

    x: (B, in_dim), weight: (out_dim, in_dim), bias: (out_dim,) or None.
    """
    B, K = x.shape
    N, K_w = weight.shape
    assert K_w == K, "weight in_dim must match x"
    out_dtype = x.dtype

    # For genuinely tiny problems a custom kernel is pure overhead.
    operand_bytes = 4 * (B * K + N * K + B * N)
    if not force_pallas and operand_bytes < (1 << 20):
        y = x @ weight.T
        if bias is not None:
            y = y + bias
        return y.astype(out_dtype)

    compute_dtype = jnp.bfloat16 if use_bf16 else x.dtype
    elt = jnp.dtype(compute_dtype).itemsize
    unit_m = 16 if jnp.dtype(compute_dtype) == jnp.dtype(jnp.bfloat16) else 8

    # ---- tile selection: minimize padding, big tiles, lane-dense output ----
    TM, B_pad = _pick_tile(B, unit_m, 256)
    TN, N_pad = _pick_tile(N, 128, 512)
    TK, K_pad = _pick_tile(K, 128, 1024)

    # ---- prepare operands (zero padding contributes nothing) ----
    x_p = x.astype(compute_dtype)
    if (B_pad, K_pad) != (B, K):
        x_p = jnp.pad(x_p, ((0, B_pad - B), (0, K_pad - K)))

    # One-time transpose to (K, N): canonical (TM,TK)x(TK,TN) MXU layout in the
    # kernel (no per-step RHS transpose risk). Fused with padding by XLA.
    w_t = weight.astype(compute_dtype).T
    if (K_pad, N_pad) != (K, N):
        w_t = jnp.pad(w_t, ((0, K_pad - K), (0, N_pad - N)))

    grid = (B_pad // TM, N_pad // TN, K_pad // TK)
    m_blocks, n_blocks, k_blocks = grid

    in_specs = [
        pl.BlockSpec((TM, TK), lambda m, n, k: (m, k)),   # x tile
        pl.BlockSpec((TK, TN), lambda m, n, k: (k, n)),   # weight.T tile
    ]
    args = [x_p, w_t]

    if bias is not None:
        b_p = bias.astype(jnp.float32)
        if N_pad != N:
            b_p = jnp.pad(b_p, (0, N_pad - N))
        b_p = b_p.reshape(1, N_pad)
        in_specs.append(pl.BlockSpec((1, TN), lambda m, n, k: (0, n)))
        args.append(b_p)
        kernel = _linear_bias_kernel
    else:
        kernel = _linear_nobias_kernel

    # Honest bytes_accessed: padded shapes + re-streaming factors.
    bytes_accessed = (
        B_pad * K_pad * elt * n_blocks          # x re-read per n-block
        + K_pad * N_pad * elt * m_blocks        # weight re-read per m-block
        + B_pad * N_pad * 4                     # f32 output writeback
        + (N_pad * 4 * m_blocks if bias is not None else 0)
    )
    cost = pl.CostEstimate(
        flops=2 * B_pad * K_pad * N_pad,
        transcendentals=0,
        bytes_accessed=bytes_accessed,
    )

    # VMEM budget: double-buffered inputs + double-buffered f32 output + bias.
    vmem_est = 2 * (TM * TK + TK * TN) * elt + 2 * TM * TN * 4 + 2 * TN * 4
    vmem_limit = min(48 * 1024 * 1024, max(32 * 1024 * 1024, 2 * vmem_est))

    y_pad = pl.pallas_call(
        kernel,
        out_shape=jax.ShapeDtypeStruct((B_pad, N_pad), jnp.float32),
        grid_spec=pltpu.PrefetchScalarGridSpec(
            num_scalar_prefetch=0,
            grid=grid,
            in_specs=in_specs,
            out_specs=pl.BlockSpec((TM, TN), lambda m, n, k: (m, n)),
        ),
        compiler_params=pltpu.CompilerParams(
            dimension_semantics=("parallel", "parallel", "arbitrary"),
            vmem_limit_bytes=vmem_limit,
        ),
        cost_estimate=cost,
    )(*args)

    return y_pad[:B, :N].astype(out_dtype)


if __name__ == "__main__":
    key = jax.random.PRNGKey(0)

    # --- tiny shapes matching the module's probe use (force the Pallas path) ---
    kx, kw, kb = jax.random.split(key, 3)
    B, in_dim, out_dim = 8, 32, 16
    x = jax.random.normal(kx, (B, in_dim), dtype=jnp.float32)
    bound = 1.0 / jnp.sqrt(jnp.float32(in_dim))
    weight = jax.random.uniform(kw, (out_dim, in_dim), minval=-bound,
                                maxval=bound, dtype=jnp.float32)
    bias = jax.random.uniform(kb, (out_dim,), minval=-bound, maxval=bound,
                              dtype=jnp.float32)

    y = linear_probe(x, weight, bias, force_pallas=True)
    jax.block_until_ready(y)
    y_ref = x @ weight.T + bias
    assert y.shape == (B, out_dim)
    assert jnp.allclose(y, y_ref, atol=1e-4, rtol=1e-4)

    # --- same shapes, bias=False path (no bias operand DMA'd at all) ---
    y_nb = linear_probe(x, weight, None, force_pallas=True)
    jax.block_until_ready(y_nb)
    assert jnp.allclose(y_nb, x @ weight.T, atol=1e-4, rtol=1e-4)

    # --- medium shapes: multi-block N tiling with zero-padding waste (TN=384) ---
    k2x, k2w, k2b = jax.random.split(jax.random.PRNGKey(1), 3)
    B2, K2, N2 = 96, 1024, 384
    x2 = jax.random.normal(k2x, (B2, K2), dtype=jnp.float32)
    bnd2 = 1.0 / jnp.sqrt(jnp.float32(K2))
    w2 = jax.random.uniform(k2w, (N2, K2), minval=-bnd2, maxval=bnd2,
                            dtype=jnp.float32)
    b2 = jax.random.uniform(k2b, (N2,), minval=-bnd2, maxval=bnd2,
                            dtype=jnp.float32)

    y2 = linear_probe(x2, w2, b2, force_pallas=True)
    jax.block_until_ready(y2)
    y2_ref = x2 @ w2.T + b2
    assert y2.shape == (B2, N2)
    assert jnp.allclose(y2, y2_ref, atol=1e-3, rtol=1e-3)

    # --- K large enough to force multi-step K accumulation (TK=640, 2 k-blocks),
    #     bias added exactly once via the k==0 initializer ---
    k3x, k3w, k3b = jax.random.split(jax.random.PRNGKey(2), 3)
    B3, K3, N3 = 40, 1280, 256
    x3 = jax.random.normal(k3x, (B3, K3), dtype=jnp.float32)
    bnd3 = 1.0 / jnp.sqrt(jnp.float32(K3))
    w3 = jax.random.uniform(k3w, (N3, K3), minval=-bnd3, maxval=bnd3,
                            dtype=jnp.float32)
    b3 = jax.random.uniform(k3b, (N3,), minval=-bnd3, maxval=bnd3,
                            dtype=jnp.float32)

    y3 = linear_probe(x3, w3, b3, force_pallas=True)
    jax.block_until_ready(y3)
    y3_ref = x3 @ w3.T + b3
    assert y3.shape == (B3, N3)
    assert jnp.allclose(y3, y3_ref, atol=1e-3, rtol=1e-3)

    print("KERNEL_OK")
</pallas_src>

<mosaic_0001>
module attributes {stable_mosaic.version = 11 : i64} {
  func.func @_linear_bias_kernel(%arg0: i32, %arg1: i32, %arg2: i32, %arg3: memref<8x128xf32, #tpu.memory_space<vmem>>, %arg4: memref<128x128xf32, #tpu.memory_space<vmem>>, %arg5: memref<1x128xf32, #tpu.memory_space<vmem>>, %arg6: memref<8x128xf32, #tpu.memory_space<vmem>>) attributes {dimension_semantics = [#tpu.dimension_semantics<parallel>, #tpu.dimension_semantics<parallel>, #tpu.dimension_semantics<arbitrary>], iteration_bounds = array<i64: 1, 1, 1>, scalar_prefetch = 0 : i64, scratch_operands = 0 : i64, tpu.core_type = #tpu.core_type<tc>, window_params = [{transform_indices = @transform_0, window_bounds = array<i64: 8, 128>}, {transform_indices = @transform_1, window_bounds = array<i64: 128, 128>}, {transform_indices = @transform_2, window_bounds = array<i64: 1, 128>}, {transform_indices = @transform_3, window_bounds = array<i64: 8, 128>}]} {
    %c0_i32 = arith.constant 0 : i32
    %0 = arith.cmpi eq, %arg2, %c0_i32 : i32
    %1 = arith.extui %0 : i1 to i32
    %c0_i32_0 = arith.constant 0 : i32
    %2 = arith.cmpi ne, %1, %c0_i32_0 : i32
    scf.if %2 {
      %c0_8 = arith.constant 0 : index
      %c0_9 = arith.constant 0 : index
      %9 = vector.load %arg5[%c0_8, %c0_9] : memref<1x128xf32, #tpu.memory_space<vmem>>, vector<1x128xf32>
      %10 = vector.shape_cast %9 : vector<1x128xf32> to vector<1x128xf32>
      %11 = vector.broadcast %10 : vector<1x128xf32> to vector<8x128xf32>
      %c0_10 = arith.constant 0 : index
      %c0_11 = arith.constant 0 : index
      %12 = vector.load %arg6[%c0_10, %c0_11] : memref<8x128xf32, #tpu.memory_space<vmem>>, vector<8x128xf32>
      tpu.vector_store %arg6[%c0_10, %c0_11], %11 {strides = array<i32>} : memref<8x128xf32, #tpu.memory_space<vmem>>, vector<8x128xf32>,
    } else {
    }
    %c0 = arith.constant 0 : index
    %c0_1 = arith.constant 0 : index
    %3 = vector.load %arg6[%c0, %c0_1] : memref<8x128xf32, #tpu.memory_space<vmem>>, vector<8x128xf32>
    %c0_2 = arith.constant 0 : index
    %c0_3 = arith.constant 0 : index
    %4 = vector.load %arg3[%c0_2, %c0_3] : memref<8x128xf32, #tpu.memory_space<vmem>>, vector<8x128xf32>
    %c0_4 = arith.constant 0 : index
    %c0_5 = arith.constant 0 : index
    %5 = vector.load %arg4[%c0_4, %c0_5] : memref<128x128xf32, #tpu.memory_space<vmem>>, vector<128x128xf32>
    %cst = arith.constant dense<0.000000e+00> : vector<8x128xf32>
    %6 = tpu.matmul %4, %5, %cst {dimension_numbers = #tpu.dot_dimension_numbers<[1], [0], [0], [1], [0, 0, 1, 1], [], []>} : vector<8x128xf32>, vector<128x128xf32>, vector<8x128xf32> -> vector<8x128xf32>
    %7 = arith.addf %3, %6 : vector<8x128xf32>
    %c0_6 = arith.constant 0 : index
    %c0_7 = arith.constant 0 : index
    %8 = vector.load %arg6[%c0_6, %c0_7] : memref<8x128xf32, #tpu.memory_space<vmem>>, vector<8x128xf32>
    tpu.vector_store %arg6[%c0_6, %c0_7], %7 {strides = array<i32>} : memref<8x128xf32, #tpu.memory_space<vmem>>, vector<8x128xf32>,
    return
  }
  func.func @transform_0(%arg0: i32, %arg1: i32, %arg2: i32) -> (i32, i32) {
    %c0_i32 = arith.constant 0 : i32
    return %arg0, %arg2 : i32, i32
  }
  func.func @transform_1(%arg0: i32, %arg1: i32, %arg2: i32) -> (i32, i32) {
    %c0_i32 = arith.constant 0 : i32
    return %arg2, %arg1 : i32, i32
  }
  func.func @transform_2(%arg0: i32, %arg1: i32, %arg2: i32) -> (i32, i32) {
    %c0_i32 = arith.constant 0 : i32
    %c0_i32_0 = arith.constant 0 : i32
    return %c0_i32, %arg1 : i32, i32
  }
  func.func @transform_3(%arg0: i32, %arg1: i32, %arg2: i32) -> (i32, i32) {
    %c0_i32 = arith.constant 0 : i32
    return %arg0, %arg1 : i32, i32
  }
}

</mosaic_0001>

<bundles_post_ra>
// kernel: tpu_custom_call.1
= control target key start
LH: loop header
LB: loop body
LE: loop exit
PB: predicated region body
PF: predicated region fallthrough
CT: control target
= control target key end

     0   :  { %8 = vsyncpa [#allocation3], 0  ;;  %s390_s0 = inlined_call_operand.hbm [shape: f32[8,128], index: 0, kind: input, shape index: {}]   ;;  %s391_s1 = inlined_call_operand.hbm [shape: f32[128,128], index: 1, kind: input, shape index: {}]   ;;  %s392_s2 = inlined_call_operand.vmem [shape: f32[1,128], index: 2, kind: input, shape index: {}]   ;;  %s393_s3 = inlined_call_operand.hbm [shape: f32[8,128], index: 3, kind: output, shape index: {}]  }
   0x1   :  { %9 = vsyncpa [#allocation6], 0 }
   0x2   :  { %10 = vsyncpa [#allocation4], 0  ;;  %s316_s12 = smov [#allocation2]   ;;  %s317_s14 = smov [#allocation5]  }
   0x3   :  { %s17_s13 = sshll.u32 %s316_s12, 4  ;;  %s26_s15 = sshll.u32 %s317_s14, 4  ;;  %s18_s13 = int_to_ptr.vmem [resolvable:$true] %s17_s13  ;;  %s344_s15 = int_to_ptr.vmem [resolvable:$true] %s26_s15 }
   0x4   :  { %s244_s18 = scalar_lea.hbm %s390_s0, 128 }
   0x5   :  { %p245_p0 = scmp.ne.s32.totalorder %s390_s0, %s244_s18  ;;  %p248_p1 = scmp.lt.u32.totalorder %s244_s18, %s390_s0 }
   0x7   :  { %p250_p2 = pnand %p248_p1, %p245_p0 }
   0x9   :  { %253 = shalt.err (!%p250_p2)
}
   0xa   :  { %s254_s23 = scalar_lea.vmem %s18_s13, 128  ;;  %p259_p4 = scmp.lt.s32.totalorder %s18_s13, %s18_s13 }
   0xb   :  { %p255_p3 = scmp.ne.s32.totalorder %s18_s13, %s254_s23  ;;  %p260_p5 = scmp.lt.s32.totalorder %s254_s23, %s254_s23 }
   0xd   :  { %p261_p6 = por %p260_p5, %p259_p4 }
   0xf   :  { %p262_p7 = pnand %p261_p6, %p255_p3 }
  0x11   :  { %265 = shalt.err (!%p262_p7)
}
  0x12   :  { %20 = dma.hbm_to_vmem [thread:$0]  %s390_s0, 128, %s18_s13, [#allocation3]  }
  0x13   :  { %s266_s28 = scalar_lea.hbm %s391_s1, 2048 }
  0x14   :  { %p267_p8 = scmp.ne.s32.totalorder %s391_s1, %s266_s28  ;;  %p270_p9 = scmp.lt.u32.totalorder %s266_s28, %s391_s1 }
  0x16   :  { %p272_p10 = pnand %p270_p9, %p267_p8 }
  0x18   :  { %275 = shalt.err (!%p272_p10)
}
  0x19   :  { %s276_s6 = scalar_lea.vmem %s344_s15, 2048  ;;  %p281_p12 = scmp.lt.s32.totalorder %s344_s15, %s344_s15 }
  0x1a   :  { %p277_p11 = scmp.ne.s32.totalorder %s344_s15, %s276_s6  ;;  %p282_p13 = scmp.lt.s32.totalorder %s276_s6, %s276_s6 }
  0x1c   :  { %p283_p0 = por %p282_p13, %p281_p12 }
  0x1e   :  { %p284_p1 = pnand %p283_p0, %p277_p11 }
  0x20   :  { %287 = shalt.err (!%p284_p1)
}
  0x21   :  { %s318_s0 = smov 128   ;;  %s319_s7 = smov 8  }
  0x22   :  { %32 = dma.hbm_to_vmem [thread:$0]  %s391_s1, 2048, %s344_s15, [#allocation6], %s318_s0, %s318_s0, %s319_s7  }
  0x23   :  { %310 = dma.done.wait [#allocation3], 128  }
  0x24   :  { %311 = vsyncadd [#allocation3], 4294967168 }
  0x25   :  { %312 = dma.done.wait [#allocation6], 2048  }
  0x26   :  { %313 = vsyncadd [#allocation6], 4294965248  ;;  %v320_v0 = vmov 0.0|0.0   ;;  %vm321_vm0 = vmmov 0   ;;  %v322_v1 = vmov 0.0   ;;  %v55_v2 = vld [vmem:[#allocation5] sm:$0xff] }
  0x27   :  { %212 = vmatprep.subr.bf16.mxu0 %v320_v0  ;;  %209 = vmatprep.mubr.msk.f32.mxu0 %vm321_vm0, %v322_v1  ;;  %v56_v3 = vld [vmem:[#allocation5 + $0x8] sm:$0xff]  ;;  %v57_v4 = vld [vmem:[#allocation5 + $0x10] sm:$0xff]  ;;  %v58_v6 = vld [vmem:[#allocation5 + $0x18] sm:$0xff]  ;;  %s323_s11 = smov [#allocation7]  }
  0x28   :  { %v213_v5 = vpack.c.bf16 %v56_v3, %v55_v2  ;;  %v216_v7 = vpack.c.bf16 %v58_v6, %v57_v4  ;;  %v59_v8 = vld [vmem:[#allocation5 + $0x20] sm:$0xff]  ;;  %v60_v9 = vld [vmem:[#allocation5 + $0x28] sm:$0xff]  ;;  %v61_v11 = vld [vmem:[#allocation5 + $0x30] sm:$0xff]  ;;  %s149_s12 = sshll.u32 %s323_s11, 4  ;;  %s150_s12 = int_to_ptr.vmem [resolvable:$true] %s149_s12 }
  0x29   :  { %v219_v10 = vpack.c.bf16 %v60_v9, %v59_v8  ;;  %v62_v12 = vld [vmem:[#allocation5 + $0x38] sm:$0xff]  ;;  %v63_v14 = vld [vmem:[#allocation5 + $0x40] sm:$0xff]  ;;  %v64_v15 = vld [vmem:[#allocation5 + $0x48] sm:$0xff]  ;;  %s288_s13 = scalar_lea.vmem %s150_s12, 128  ;;  %p293_p3 = scmp.lt.s32.totalorder %s150_s12, %s150_s12 }
  0x2a   :  { %214 = vmatpush3.bf16.msra.mxu0 %v213_v5  ;;  %v222_v13 = vpack.c.bf16 %v62_v12, %v61_v11  ;;  %v225_v16 = vpack.c.bf16 %v64_v15, %v63_v14  ;;  %v65_v17 = vld [vmem:[#allocation5 + $0x50] sm:$0xff]  ;;  %v66_v18 = vld [vmem:[#allocation5 + $0x58] sm:$0xff]  ;;  %v67_v20 = vld [vmem:[#allocation5 + $0x60] sm:$0xff]  ;;  %p289_p2 = scmp.ne.s32.totalorder %s150_s12, %s288_s13  ;;  %p294_p4 = scmp.lt.s32.totalorder %s288_s13, %s288_s13 }
  0x2b   :  { %215 = vmatprep.subr.bf16.mxu0 %v320_v0  ;;  %v228_v19 = vpack.c.bf16 %v66_v18, %v65_v17  ;;  %v68_v21 = vld [vmem:[#allocation5 + $0x68] sm:$0xff]  ;;  %v69_v23 = vld [vmem:[#allocation5 + $0x70] sm:$0xff]  ;;  %v70_v24 = vld [vmem:[#allocation5 + $0x78] sm:$0xff] }
  0x2c   :  { %v231_v22 = vpack.c.bf16 %v68_v21, %v67_v20  ;;  %v234_v25 = vpack.c.bf16 %v70_v24, %v69_v23  ;;  %v54_v26 = vld [vmem:[#allocation2] sm:$0xff]  ;;  %p295_p5 = por %p294_p4, %p293_p3 }
  0x2d   :  { %v159_v27 = vld [vmem:[%s392_s2] ss:$0 sm:$0xff] }
  0x2e   :  { %217 = vmatpush3.bf16.msra.mxu0 %v216_v7  ;;  %p296_p6 = pnand %p295_p5, %p289_p2 }
  0x2f   :  { %218 = vmatprep.subr.bf16.mxu0 %v320_v0 }
  0x32   :  { %220 = vmatpush3.bf16.msra.mxu0 %v219_v10 }
  0x33   :  { %221 = vmatprep.subr.bf16.mxu0 %v320_v0 }
  0x36   :  { %223 = vmatpush3.bf16.msra.mxu0 %v222_v13 }
  0x37   :  { %224 = vmatprep.subr.bf16.mxu0 %v320_v0 }
  0x3a   :  { %226 = vmatpush3.bf16.msra.mxu0 %v225_v16 }
  0x3b   :  { %227 = vmatprep.subr.bf16.mxu0 %v320_v0 }
  0x3e   :  { %229 = vmatpush3.bf16.msra.mxu0 %v228_v19 }
  0x3f   :  { %230 = vmatprep.subr.bf16.mxu0 %v320_v0 }
  0x42   :  { %232 = vmatpush3.bf16.msra.mxu0 %v231_v22 }
  0x43   :  { %233 = vmatprep.subr.bf16.mxu0 %v320_v0 }
  0x46   :  { %235 = vmatpush3.bf16.msra.mxu0 %v234_v25 }
  0x49   :  { %210 = vmatmul.mubr.f32.vlgmr.msra.gmra.mrb[0].mxu0 %v54_v26 }
 0x11c   :  { %v137_v28 = vpop.f32.mrb[0].mxu0 }
 0x11d   :  { %v141_v29 = vadd.f32 %v159_v27, %v137_v28  ;;  %v211_v30 = vpop.f32.mrb[1].mxu0 }
 0x11f   :  { %142 = vst [vmem:[#allocation7] sm:$0xff] %v141_v29 }
 0x120   :  { %299 = shalt.err (!%p296_p6)
}
 0x121   :  { %s300_s16 = scalar_lea.hbm %s393_s3, 128 }
 0x122   :  { %p301_p7 = scmp.ne.s32.totalorder %s393_s3, %s300_s16  ;;  %p304_p8 = scmp.lt.u32.totalorder %s300_s16, %s393_s3 }
 0x124   :  { %p306_p9 = pnand %p304_p8, %p301_p7 }
 0x126   :  { %309 = shalt.err (!%p306_p9)
}
 0x127   :  { %152 = dma.vmem_to_hbm [thread:$0]  %s150_s12, 128, %s393_s3, [#allocation4]  }
 0x128   :  { %314 = dma.done.wait [#allocation4], 128  }
 0x129   :  { %315 = vsyncadd [#allocation4], 4294967168 }
 0x12a   :  { %156 = vsyncpa [#allocation3], 1 }
 0x12b   :  { %157 = vsyncpa [#allocation6], 1 }
 0x12c   :  { %158 = vsyncpa [#allocation4], 1 }

</bundles_post_ra>
